<compile_context>
chip_gen: v5e
topology: v5e:2x2
jax: 0.10.0
libtpu: 0.0.40
codegen_flags: <defaults>
</compile_context>

<pallas_src>
import functools

import jax
import jax.numpy as jnp
from jax import lax
from jax.experimental import pallas as pl
from jax.experimental.pallas import tpu as pltpu


# ----------------------------------------------------------------------------
# Pallas kernel: one (batch, output-pixel-tile) step.
#   base_ref: (2, TILE_M)      f32  base (w, h) integer grid for this tile
#   x_ref:    (1, C*H, W)      bf16 source image rows (resident across tiles)
#   flow_ref: (1, 2, TILE_M)   f32  flow[0]=dx (along W), flow[1]=dy (along H)
#   o_ref:    (1, C, TILE_M)   f32  warped output tile
# ----------------------------------------------------------------------------
def _warp_kernel(base_ref, x_ref, flow_ref, o_ref, *, H, W, C):
    tile_m = o_ref.shape[-1]

    flo = flow_ref[0]                       # (2, TILE_M)
    fx = flo[0:1, :]                        # (1, TILE_M)
    fy = flo[1:2, :]
    base = base_ref[...]                    # (2, TILE_M)
    bw = base[0:1, :]
    bh = base[1:2, :]

    # Unnormalized source coords for align_corners=False grid_sample:
    #   ix = (w + fx) * W/(W-1) - 0.5 ,  iy = (h + fy) * H/(H-1) - 0.5
    ix = (bw + fx) * (W / (W - 1.0)) - 0.5
    iy = (bh + fy) * (H / (H - 1.0)) - 0.5

    ix0f = jnp.floor(ix)
    iy0f = jnp.floor(iy)
    tx = ix - ix0f
    ty = iy - iy0f
    ix0 = ix0f.astype(jnp.int32)
    iy0 = iy0f.astype(jnp.int32)
    ix1 = ix0 + 1
    iy1 = iy0 + 1

    # Column (x-corner) one-hot weights, zeros-padding masked: Sx (W, TILE_M).
    w_iota = lax.broadcasted_iota(jnp.int32, (W, tile_m), 0)
    wx0 = jnp.where((ix0 >= 0) & (ix0 < W), 1.0 - tx, 0.0)
    wx1 = jnp.where((ix1 >= 0) & (ix1 < W), tx, 0.0)
    sx = (jnp.where(w_iota == ix0, wx0, 0.0)
          + jnp.where(w_iota == ix1, wx1, 0.0))              # (W, TILE_M) f32

    # Row (y-corner) one-hot weights: Sy (H, TILE_M).
    h_iota = lax.broadcasted_iota(jnp.int32, (H, tile_m), 0)
    wy0 = jnp.where((iy0 >= 0) & (iy0 < H), 1.0 - ty, 0.0)
    wy1 = jnp.where((iy1 >= 0) & (iy1 < H), ty, 0.0)
    sy = (jnp.where(h_iota == iy0, wy0, 0.0)
          + jnp.where(h_iota == iy1, wy1, 0.0))              # (H, TILE_M) f32

    # x-interpolation on the MXU: (C*H, W) @ (W, TILE_M) -> (C*H, TILE_M),
    # bf16 operands, f32 accumulation.
    tmp = jnp.dot(x_ref[0], sx.astype(jnp.bfloat16),
                  preferred_element_type=jnp.float32)        # (C*H, TILE_M)

    # y-interpolation: weighted reduce over the H source rows (VPU/XLU).
    tmp3 = tmp.reshape(C, H, tile_m)
    out = jnp.sum(tmp3 * sy[None, :, :], axis=1)             # (C, TILE_M)
    o_ref[0] = out.astype(o_ref.dtype)


# ----------------------------------------------------------------------------
# Wrapper: NCHW in / NCHW out.  Output pixels flattened row-major (m = h*W+w),
# padded to a multiple of 128 lanes and tiled over a parallel grid axis.
# ----------------------------------------------------------------------------
def warping_layer(x, flow, *, tile_m=128):
    N, C, H, W = x.shape
    assert flow.shape == (N, 2, H, W)
    HW = H * W
    HWp = pl.cdiv(HW, 128) * 128          # lane-align the output-pixel axis

    # Pick an output-pixel tile that divides HWp (HWp is a multiple of 128).
    tile_m = min(tile_m, HWp)
    if HWp % tile_m != 0:
        tile_m = 128
    n_mt = HWp // tile_m

    # MXU LHS: (N, C*H, W), pre-cast to bf16 (halves DMA + matches MXU dtype).
    x2 = x.reshape(N, C * H, W).astype(jnp.bfloat16)

    # Flow flattened over output pixels, zero-padded lanes.
    flow_flat = flow.reshape(N, 2, HW)
    if HWp != HW:
        flow_flat = jnp.pad(flow_flat, ((0, 0), (0, 0), (0, HWp - HW)))

    # Precomputed base (w, h) grid per output pixel (hoists //W, %W out of the
    # kernel).  Padded lanes get h >= H -> both y-corners invalid -> zeros.
    m = jnp.arange(HWp, dtype=jnp.int32)
    base = jnp.stack([(m % W).astype(jnp.float32),
                      (m // W).astype(jnp.float32)], axis=0)   # (2, HWp)

    kernel = functools.partial(_warp_kernel, H=H, W=W, C=C)
    out = pl.pallas_call(
        kernel,
        out_shape=jax.ShapeDtypeStruct((N, C, HWp), jnp.float32),
        grid=(N, n_mt),
        in_specs=[
            pl.BlockSpec((2, tile_m), lambda n, mt: (0, mt)),         # base grid
            pl.BlockSpec((1, C * H, W), lambda n, mt: (n, 0, 0)),     # x (resident per n)
            pl.BlockSpec((1, 2, tile_m), lambda n, mt: (n, 0, mt)),   # flow tile
        ],
        out_specs=pl.BlockSpec((1, C, tile_m), lambda n, mt: (n, 0, mt)),
        compiler_params=pltpu.CompilerParams(
            dimension_semantics=("parallel", "parallel")),
    )(base, x2, flow_flat)

    return out[:, :, :HW].reshape(N, C, H, W)


# ----------------------------------------------------------------------------
# Pure-JAX reference (bilinear, zeros padding, align_corners=False)
# ----------------------------------------------------------------------------
def reference_forward(x, flow):
    N, C, H, W = x.shape
    xs = jnp.linspace(-1.0, 1.0, W)
    ys = jnp.linspace(-1.0, 1.0, H)
    gx = xs[None, None, :] + flow[:, 0] / ((W - 1.0) / 2.0)   # (N, H, W)
    gy = ys[None, :, None] + flow[:, 1] / ((H - 1.0) / 2.0)   # (N, H, W)

    ix = ((gx + 1.0) * W - 1.0) / 2.0
    iy = ((gy + 1.0) * H - 1.0) / 2.0
    ix0f = jnp.floor(ix)
    iy0f = jnp.floor(iy)
    tx = ix - ix0f
    ty = iy - iy0f
    ix0 = ix0f.astype(jnp.int32)
    iy0 = iy0f.astype(jnp.int32)
    ix1 = ix0 + 1
    iy1 = iy0 + 1

    def tap(iyk, ixk, wk):
        valid = (ixk >= 0) & (ixk < W) & (iyk >= 0) & (iyk < H)
        ixc = jnp.clip(ixk, 0, W - 1)
        iyc = jnp.clip(iyk, 0, H - 1)
        v = jax.vmap(lambda img, yy, xx: img[:, yy, xx])(x, iyc, ixc)  # (N,C,H,W)
        return v * jnp.where(valid, wk, 0.0)[:, None, :, :]

    return (tap(iy0, ix0, (1.0 - ty) * (1.0 - tx))
            + tap(iy0, ix1, (1.0 - ty) * tx)
            + tap(iy1, ix0, ty * (1.0 - tx))
            + tap(iy1, ix1, ty * tx))


if __name__ == "__main__":
    N, C, H, W = 2, 4, 16, 16
    key = jax.random.PRNGKey(0)
    kx, kf = jax.random.split(key)
    x = jax.random.normal(kx, (N, C, H, W), dtype=jnp.float32)
    # Flow of a few pixels: exercises interior bilinear taps and border zeros.
    flow = 3.0 * jax.random.normal(kf, (N, 2, H, W), dtype=jnp.float32)

    out = jax.block_until_ready(jax.jit(warping_layer)(x, flow))
    ref = jax.block_until_ready(reference_forward(x, flow))

    assert out.shape == (N, C, H, W), out.shape
    max_err = float(jnp.max(jnp.abs(out - ref)))
    assert jnp.allclose(out, ref, rtol=2e-2, atol=2e-2), max_err

    print("KERNEL_OK")
</pallas_src>

<mosaic_0001>
module attributes {stable_mosaic.version = 11 : i64} {
  func.func @_warp_kernel(%arg0: i32, %arg1: i32, %arg2: memref<2x128xf32, #tpu.memory_space<vmem>>, %arg3: memref<1x64x16xbf16, #tpu.memory_space<vmem>>, %arg4: memref<1x2x128xf32, #tpu.memory_space<vmem>>, %arg5: memref<1x4x128xf32, #tpu.memory_space<vmem>>) attributes {dimension_semantics = [#tpu.dimension_semantics<parallel>, #tpu.dimension_semantics<parallel>], iteration_bounds = array<i64: 2, 2>, scalar_prefetch = 0 : i64, scratch_operands = 0 : i64, tpu.core_type = #tpu.core_type<tc>, window_params = [{transform_indices = @transform_0, window_bounds = array<i64: 2, 128>}, {transform_indices = @transform_1, window_bounds = array<i64: 1, 64, 16>}, {transform_indices = @transform_2, window_bounds = array<i64: 1, 2, 128>}, {transform_indices = @transform_3, window_bounds = array<i64: 1, 4, 128>}]} {
    %c0 = arith.constant 0 : index
    %c0_0 = arith.constant 0 : index
    %c0_1 = arith.constant 0 : index
    %0 = vector.load %arg4[%c0, %c0_0, %c0_1] : memref<1x2x128xf32, #tpu.memory_space<vmem>>, vector<1x2x128xf32>
    %1 = vector.shape_cast %0 : vector<1x2x128xf32> to vector<2x128xf32>
    %2 = vector.extract_strided_slice %1 {offsets = [0, 0], sizes = [1, 128], strides = [1, 1]} : vector<2x128xf32> to vector<1x128xf32>
    %3 = vector.extract_strided_slice %1 {offsets = [1, 0], sizes = [1, 128], strides = [1, 1]} : vector<2x128xf32> to vector<1x128xf32>
    %c0_2 = arith.constant 0 : index
    %c0_3 = arith.constant 0 : index
    %4 = vector.load %arg2[%c0_2, %c0_3] : memref<2x128xf32, #tpu.memory_space<vmem>>, vector<2x128xf32>
    %5 = vector.extract_strided_slice %4 {offsets = [0, 0], sizes = [1, 128], strides = [1, 1]} : vector<2x128xf32> to vector<1x128xf32>
    %6 = vector.extract_strided_slice %4 {offsets = [1, 0], sizes = [1, 128], strides = [1, 1]} : vector<2x128xf32> to vector<1x128xf32>
    %7 = arith.addf %5, %2 : vector<1x128xf32>
    %cst = arith.constant 1.06666672 : f32
    %8 = vector.broadcast %cst : f32 to vector<1x128xf32>
    %9 = arith.mulf %7, %8 : vector<1x128xf32>
    %cst_4 = arith.constant 5.000000e-01 : f32
    %10 = vector.broadcast %cst_4 : f32 to vector<1x128xf32>
    %11 = arith.subf %9, %10 : vector<1x128xf32>
    %12 = arith.addf %6, %3 : vector<1x128xf32>
    %cst_5 = arith.constant 1.06666672 : f32
    %13 = vector.broadcast %cst_5 : f32 to vector<1x128xf32>
    %14 = arith.mulf %12, %13 : vector<1x128xf32>
    %cst_6 = arith.constant 5.000000e-01 : f32
    %15 = vector.broadcast %cst_6 : f32 to vector<1x128xf32>
    %16 = arith.subf %14, %15 : vector<1x128xf32>
    %17 = math.floor %11 : vector<1x128xf32>
    %18 = math.floor %16 : vector<1x128xf32>
    %19 = arith.subf %11, %17 : vector<1x128xf32>
    %20 = arith.subf %16, %18 : vector<1x128xf32>
    %21 = arith.fptosi %17 : vector<1x128xf32> to vector<1x128xi32>
    %22 = arith.fptosi %18 : vector<1x128xf32> to vector<1x128xi32>
    %c1_i32 = arith.constant 1 : i32
    %23 = vector.broadcast %c1_i32 : i32 to vector<1x128xi32>
    %24 = arith.addi %21, %23 : vector<1x128xi32>
    %c1_i32_7 = arith.constant 1 : i32
    %25 = vector.broadcast %c1_i32_7 : i32 to vector<1x128xi32>
    %26 = arith.addi %22, %25 : vector<1x128xi32>
    %27 = tpu.iota {dimensions = array<i32: 0>} : vector<16x128xi32>
    %c0_i32 = arith.constant 0 : i32
    %28 = vector.broadcast %c0_i32 : i32 to vector<1x128xi32>
    %29 = arith.cmpi sge, %21, %28 : vector<1x128xi32>
    %c16_i32 = arith.constant 16 : i32
    %30 = vector.broadcast %c16_i32 : i32 to vector<1x128xi32>
    %31 = arith.cmpi slt, %21, %30 : vector<1x128xi32>
    %32 = arith.andi %29, %31 : vector<1x128xi1>
    %cst_8 = arith.constant 1.000000e+00 : f32
    %33 = vector.broadcast %cst_8 : f32 to vector<1x128xf32>
    %34 = arith.subf %33, %19 : vector<1x128xf32>
    %cst_9 = arith.constant 0.000000e+00 : f32
    %35 = vector.broadcast %cst_9 : f32 to vector<1x128xf32>
    %36 = arith.select %32, %34, %35 : vector<1x128xi1>, vector<1x128xf32>
    %c0_i32_10 = arith.constant 0 : i32
    %37 = vector.broadcast %c0_i32_10 : i32 to vector<1x128xi32>
    %38 = arith.cmpi sge, %24, %37 : vector<1x128xi32>
    %c16_i32_11 = arith.constant 16 : i32
    %39 = vector.broadcast %c16_i32_11 : i32 to vector<1x128xi32>
    %40 = arith.cmpi slt, %24, %39 : vector<1x128xi32>
    %41 = arith.andi %38, %40 : vector<1x128xi1>
    %cst_12 = arith.constant 0.000000e+00 : f32
    %42 = vector.broadcast %cst_12 : f32 to vector<1x128xf32>
    %43 = arith.select %41, %19, %42 : vector<1x128xi1>, vector<1x128xf32>
    %44 = vector.broadcast %21 : vector<1x128xi32> to vector<16x128xi32>
    %45 = arith.cmpi eq, %27, %44 : vector<16x128xi32>
    %cst_13 = arith.constant 0.000000e+00 : f32
    %46 = vector.shape_cast %36 : vector<1x128xf32> to vector<1x128xf32>
    %47 = vector.broadcast %46 : vector<1x128xf32> to vector<16x128xf32>
    %48 = vector.broadcast %cst_13 : f32 to vector<16x128xf32>
    %49 = arith.select %45, %47, %48 : vector<16x128xi1>, vector<16x128xf32>
    %50 = vector.broadcast %24 : vector<1x128xi32> to vector<16x128xi32>
    %51 = arith.cmpi eq, %27, %50 : vector<16x128xi32>
    %cst_14 = arith.constant 0.000000e+00 : f32
    %52 = vector.shape_cast %43 : vector<1x128xf32> to vector<1x128xf32>
    %53 = vector.broadcast %52 : vector<1x128xf32> to vector<16x128xf32>
    %54 = vector.broadcast %cst_14 : f32 to vector<16x128xf32>
    %55 = arith.select %51, %53, %54 : vector<16x128xi1>, vector<16x128xf32>
    %56 = arith.addf %49, %55 : vector<16x128xf32>
    %57 = tpu.iota {dimensions = array<i32: 0>} : vector<16x128xi32>
    %c0_i32_15 = arith.constant 0 : i32
    %58 = vector.broadcast %c0_i32_15 : i32 to vector<1x128xi32>
    %59 = arith.cmpi sge, %22, %58 : vector<1x128xi32>
    %c16_i32_16 = arith.constant 16 : i32
    %60 = vector.broadcast %c16_i32_16 : i32 to vector<1x128xi32>
    %61 = arith.cmpi slt, %22, %60 : vector<1x128xi32>
    %62 = arith.andi %59, %61 : vector<1x128xi1>
    %cst_17 = arith.constant 1.000000e+00 : f32
    %63 = vector.broadcast %cst_17 : f32 to vector<1x128xf32>
    %64 = arith.subf %63, %20 : vector<1x128xf32>
    %cst_18 = arith.constant 0.000000e+00 : f32
    %65 = vector.broadcast %cst_18 : f32 to vector<1x128xf32>
    %66 = arith.select %62, %64, %65 : vector<1x128xi1>, vector<1x128xf32>
    %c0_i32_19 = arith.constant 0 : i32
    %67 = vector.broadcast %c0_i32_19 : i32 to vector<1x128xi32>
    %68 = arith.cmpi sge, %26, %67 : vector<1x128xi32>
    %c16_i32_20 = arith.constant 16 : i32
    %69 = vector.broadcast %c16_i32_20 : i32 to vector<1x128xi32>
    %70 = arith.cmpi slt, %26, %69 : vector<1x128xi32>
    %71 = arith.andi %68, %70 : vector<1x128xi1>
    %cst_21 = arith.constant 0.000000e+00 : f32
    %72 = vector.broadcast %cst_21 : f32 to vector<1x128xf32>
    %73 = arith.select %71, %20, %72 : vector<1x128xi1>, vector<1x128xf32>
    %74 = vector.broadcast %22 : vector<1x128xi32> to vector<16x128xi32>
    %75 = arith.cmpi eq, %57, %74 : vector<16x128xi32>
    %cst_22 = arith.constant 0.000000e+00 : f32
    %76 = vector.shape_cast %66 : vector<1x128xf32> to vector<1x128xf32>
    %77 = vector.broadcast %76 : vector<1x128xf32> to vector<16x128xf32>
    %78 = vector.broadcast %cst_22 : f32 to vector<16x128xf32>
    %79 = arith.select %75, %77, %78 : vector<16x128xi1>, vector<16x128xf32>
    %80 = vector.broadcast %26 : vector<1x128xi32> to vector<16x128xi32>
    %81 = arith.cmpi eq, %57, %80 : vector<16x128xi32>
    %cst_23 = arith.constant 0.000000e+00 : f32
    %82 = vector.shape_cast %73 : vector<1x128xf32> to vector<1x128xf32>
    %83 = vector.broadcast %82 : vector<1x128xf32> to vector<16x128xf32>
    %84 = vector.broadcast %cst_23 : f32 to vector<16x128xf32>
    %85 = arith.select %81, %83, %84 : vector<16x128xi1>, vector<16x128xf32>
    %86 = arith.addf %79, %85 : vector<16x128xf32>
    %c0_24 = arith.constant 0 : index
    %c0_25 = arith.constant 0 : index
    %c0_26 = arith.constant 0 : index
    %87 = vector.load %arg3[%c0_24, %c0_25, %c0_26] : memref<1x64x16xbf16, #tpu.memory_space<vmem>>, vector<1x64x16xbf16>
    %88 = vector.shape_cast %87 : vector<1x64x16xbf16> to vector<64x16xbf16>
    %89 = arith.truncf %56 : vector<16x128xf32> to vector<16x128xbf16>
    %cst_27 = arith.constant dense<0.000000e+00> : vector<64x128xf32>
    %90 = tpu.matmul %88, %89, %cst_27 {dimension_numbers = #tpu.dot_dimension_numbers<[1], [0], [0], [1], [0, 0, 1, 1], [], []>} : vector<64x16xbf16>, vector<16x128xbf16>, vector<64x128xf32> -> vector<64x128xf32>
    %91 = vector.shape_cast %90 : vector<64x128xf32> to vector<4x16x128xf32>
    %92 = vector.shape_cast %86 : vector<16x128xf32> to vector<1x16x128xf32>
    %93 = vector.broadcast %92 : vector<1x16x128xf32> to vector<4x16x128xf32>
    %94 = arith.mulf %91, %93 : vector<4x16x128xf32>
    %cst_28 = arith.constant dense<0.000000e+00> : vector<4x128xf32>
    %95 = vector.multi_reduction <add>, %94, %cst_28 [1] : vector<4x16x128xf32> to vector<4x128xf32>
    %c0_29 = arith.constant 0 : index
    %c0_30 = arith.constant 0 : index
    %c0_31 = arith.constant 0 : index
    %96 = vector.load %arg5[%c0_29, %c0_30, %c0_31] : memref<1x4x128xf32, #tpu.memory_space<vmem>>, vector<1x4x128xf32>
    %97 = vector.shape_cast %96 : vector<1x4x128xf32> to vector<4x128xf32>
    %98 = vector.shape_cast %95 : vector<4x128xf32> to vector<1x4x128xf32>
    tpu.vector_store %arg5[%c0_29, %c0_30, %c0_31], %98 {strides = array<i32>} : memref<1x4x128xf32, #tpu.memory_space<vmem>>, vector<1x4x128xf32>,
    return
  }
  func.func @transform_0(%arg0: i32, %arg1: i32) -> (i32, i32) {
    %c0_i32 = arith.constant 0 : i32
    %c0_i32_0 = arith.constant 0 : i32
    return %c0_i32, %arg1 : i32, i32
  }
  func.func @transform_1(%arg0: i32, %arg1: i32) -> (i32, i32, i32) {
    %c0_i32 = arith.constant 0 : i32
    %c0_i32_0 = arith.constant 0 : i32
    %c0_i32_1 = arith.constant 0 : i32
    return %arg0, %c0_i32, %c0_i32_0 : i32, i32, i32
  }
  func.func @transform_2(%arg0: i32, %arg1: i32) -> (i32, i32, i32) {
    %c0_i32 = arith.constant 0 : i32
    %c0_i32_0 = arith.constant 0 : i32
    return %arg0, %c0_i32, %arg1 : i32, i32, i32
  }
  func.func @transform_3(%arg0: i32, %arg1: i32) -> (i32, i32, i32) {
    %c0_i32 = arith.constant 0 : i32
    %c0_i32_0 = arith.constant 0 : i32
    return %arg0, %c0_i32, %arg1 : i32, i32, i32
  }
}

</mosaic_0001>

<bundles_post_ra>
// kernel: warping_layer.1
= control target key start
LH: loop header
LB: loop body
LE: loop exit
PB: predicated region body
PF: predicated region fallthrough
CT: control target
= control target key end

     0   :  { %s663_s12 = smov 0   ;;  %s665_s13 = smov 0   ;;  %s728_s0 = inlined_call_operand.vmem [shape: f32[2,256], index: 0, kind: input, shape index: {}]   ;;  %s729_s1 = inlined_call_operand.vmem [shape: bf16[2,64,16], index: 1, kind: input, shape index: {}]   ;;  %s730_s2 = inlined_call_operand.vmem [shape: f32[2,2,256], index: 2, kind: input, shape index: {}]   ;;  %s731_s3 = inlined_call_operand.vmem [shape: f32[2,4,256], index: 3, kind: output, shape index: {}]  }
   0x1   :  { %s667_s14 = smov 0   ;;  %s669_s15 = smov 0  }
   0x2   :  { %s671_s16 = smov 0  }
   0x3 LB: > { %s22_s17 = sadd.s32 1, %s633_s14  ;;  %s25_s18 = sadd.s32 1, %s637_s15  ;;  %s641_s16 = sphi %s671_s16, %s13_s16   ;;  %s637_s15 = sphi %s669_s15, %s735_s15   ;;  %s633_s14 = sphi %s667_s14, %s734_s14   ;;  %s629_s13 = sphi %s665_s13, %s733_s13   ;;  %s625_s12 = sphi %s663_s12, %s732_s12  }
   0x4   : > { %p23_p0 = scmp.ge.s32.totalorder %s22_s17, 2  ;;  %p522_p1 = scmp.ge.s32.totalorder %s641_s16, 1 }
   0x5   : > { %p175_p2 = scmp.lt.s32.totalorder %s641_s16, 5 }
   0x6   : > { %s737_s17 = smov (%p23_p0, %s22_s17), 0  ;;  %s739_s18 = smov (!%p23_p0, %s25_s18), %s637_s15 }
   0x7   : > { %p176_p3 = pnand %p522_p1, %p175_p2  ;;  %p27_p4 = scmp.ge.s32.totalorder %s739_s18, 2 }
   0x8   : > { %p214_p5 = scmp.lt.s32.totalorder (!%p176_p3), %s625_s12, 1  ;;  %p218_p6 = scmp.lt.s32.totalorder (!%p176_p3), %s629_s13, 1 }
   0x9   : > { %s741_s18 = smov (%p27_p4, %s739_s18), 0  ;;  %179 = sbr.rel (%p176_p3) target bundleno = 205 (0xcd), region = 32 }
   0xe   : > { %s743_s12 = smov (!%p214_p5, %s625_s12), 1  ;;  %s745_s13 = smov (!%p218_p6, %s629_s13), 1  ;;  %v249_v3 = vlaneseq  ;;  %vm318_vm12 = vcmask 130048   ;;  %vm400_vm15 = vcmask 1041409  }
   0xf   : > { %s523_s19 = sshll.u32 %s743_s12, 1  ;;  %s526_s23 = sshll.u32 %s745_s13, 1 }
  0x10   : > { %s217_s22 = scalar_lea.vmem %s728_s0, %s523_s19  ;;  %s699_s24 = sadd.s32 %s526_s23, %s743_s12  ;;  %v250_v6 = vshrl.u32 %v249_v3, 7 }
  0x11   : > { %s527_s25 = sshll.u32 %s699_s24, 1  ;;  %v241_v0 = vld [vmem:[%s217_s22] sm:$0x3]  ;;  %s553_s29 = sshll.u32 %s745_s13, 5 }
  0x12   : > { %s230_s28 = scalar_lea.vmem %s730_s2, %s527_s25  ;;  %v251_v10 = vadd.s32 8, %v250_v6  ;;  %s222_s5 = scalar_lea.vmem %s729_s1, %s553_s29 }
  0x13   : > { %v240_v1 = vld [vmem:[%s230_s28] sm:$0x3]  ;;  %v555_v34 = vld [vmem:[%s222_s5 + $0x8] sm:$0xff]  ;;  %v556_v35 = vld [vmem:[%s222_s5 + $0x10] sm:$0xff]  ;;  %s529_s6 = sshll.u32 %s699_s24, 2 }
  0x14   : > { %v242_v2 = vadd.f32 %v241_v0, %v240_v1  ;;  %v554_v33 = vld [vmem:[%s222_s5] sm:$0xff]  ;;  %v557_v36 = vld [vmem:[%s222_s5 + $0x18] sm:$0xff]  ;;  %s238_s9 = scalar_lea.vmem %s731_s3, %s529_s6 }
  0x16   : > { %v243_v4 = vmul.f32 1.0666667, %v242_v2 }
  0x18   : > { %v530_v5 = vadd.f32 -0.5, %v243_v4 }
  0x1a   : > { %v245_v7 = vfloor.f32 %v530_v5 }
  0x1c   : > { %v246_v8 = vsub.f32 %v530_v5, %v245_v7  ;;  %v562_v9 = vcvt.f32.s32 %v245_v7 }
  0x1e   : > { %v248_v11 = vadd.s32 1, %v562_v9  ;;  %vm252_vm0 = vcmp.ge.s32.totalorder %v562_v9, 0  ;;  %vm253_vm1 = vcmp.lt.s32.totalorder %v562_v9, 16  ;;  %v255_v12 = vsub.f32 1.0, %v246_v8 }
  0x1f   : > { %vm254_vm2 = vmand %vm252_vm0, %vm253_vm1  ;;  %v261_v13 = vperm.slane %v562_v9, 0  ;;  %v275_v14 = vperm.slane %v562_v9, 1  ;;  %vm402_vm0 = vcmask 1042434   ;;  %vm404_vm1 = vcmask 1043459  }
  0x20   : > { %v256_v15 = vsel %vm254_vm2, %v255_v12, 0.0  ;;  %vm257_vm3 = vcmp.ge.s32.totalorder %v248_v11, 0  ;;  %vm258_vm4 = vcmp.lt.s32.totalorder %v248_v11, 16  ;;  %v267_v16 = vperm.slane %v248_v11, 0 }
  0x21   : > { %vm259_vm5 = vmand %vm257_vm3, %vm258_vm4  ;;  %vm262_vm6 = vcmp.eq.s32.totalorder %v250_v6, %v261_v13  ;;  %vm263_vm7 = vcmp.eq.s32.totalorder %v251_v10, %v261_v13  ;;  %v264_v17 = vperm.slane %v256_v15, 0  ;;  %vm276_vm8 = vcmp.eq.s32.totalorder %v250_v6, %v275_v14 }
  0x22   : > { %v260_v18 = vsel %vm259_vm5, %v246_v8, 0.0  ;;  %vm268_vm9 = vcmp.eq.s32.totalorder %v250_v6, %v267_v16  ;;  %vm269_vm10 = vcmp.eq.s32.totalorder %v251_v10, %v267_v16  ;;  %v278_v19 = vperm.slane %v256_v15, 1 }
  0x23   : > { %v265_v20 = vsel %vm262_vm6, %v264_v17, 0.0  ;;  %v266_v21 = vsel %vm263_vm7, %v264_v17, 0.0  ;;  %v270_v22 = vperm.slane %v260_v18, 0  ;;  %v281_v23 = vperm.slane %v248_v11, 1 }
  0x24   : > { %v279_v24 = vsel %vm276_vm8, %v278_v19, 0.0  ;;  %v284_v25 = vperm.slane %v260_v18, 1  ;;  %vm277_vm13 = vcmp.eq.s32.totalorder %v251_v10, %v275_v14 }
  0x25   : > { %v271_v26 = vsel %vm268_vm9, %v270_v22, 0.0  ;;  %v272_v27 = vsel %vm269_vm10, %v270_v22, 0.0  ;;  %vm282_vm11 = vcmp.eq.s32.totalorder %v250_v6, %v281_v23  ;;  %vm283_vm14 = vcmp.eq.s32.totalorder %v251_v10, %v281_v23 }
  0x26   : > { %v273_v28 = vadd.f32 %v271_v26, %v265_v20  ;;  %v274_v29 = vadd.f32 %v272_v27, %v266_v21  ;;  %v285_v30 = vsel %vm282_vm11, %v284_v25, 0.0  ;;  %v280_v37 = vsel %vm277_vm13, %v278_v19, 0.0 }
  0x27   : > { %v287_v31 = vadd.f32 %v285_v30, %v279_v24  ;;  %v286_v38 = vsel %vm283_vm14, %v284_v25, 0.0 }
  0x28   : > { %v297_v32 = vpack.c.bf16 %v274_v29, %v273_v28  ;;  %v288_v39 = vadd.f32 %v286_v38, %v280_v37 }
  0x2a   : > { %338 = vmatpush.bf16.msra.mxu0 %v297_v32  ;;  %558 = vmatpush.bf16.msra.mxu1 %v297_v32 }
  0x2b   : > { %559 = vmatpush.bf16.msra.mxu2 %v297_v32  ;;  %560 = vmatpush.bf16.msra.mxu3 %v297_v32 }
  0x2d   : > { %547 = vmatmul.msk.bf16.vlgmr.msra.gmra.mxu0 %vm318_vm12, %v554_v33  ;;  %548 = vmatmul.msk.bf16.vlgmr.msra.gmra.mxu1 %vm318_vm12, %v555_v34 }
  0x2e   : > { %549 = vmatmul.msk.bf16.vlgmr.msra.gmra.mxu2 %vm318_vm12, %v556_v35  ;;  %550 = vmatmul.msk.bf16.vlgmr.msra.gmra.mxu3 %vm318_vm12, %v557_v36 }
  0xaa   : > { %v340_v40 = vpop.f32.mrf.mxu0  ;;  %v345_v41 = vpop.f32.mrf.mxu1 }
  0xab   : > { %v360_v46 = vmul.f32 %v340_v40, %v287_v31  ;;  %v362_v47 = vmul.f32 %v345_v41, %v287_v31 }
  0xb1   : > { %v350_v42 = vpop.f32.mrf.mxu2  ;;  %v355_v43 = vpop.f32.mrf.mxu3 }
  0xb2   : > { %v342_v44 = vpop.f32.mrf.mxu0  ;;  %v347_v45 = vpop.f32.mrf.mxu1  ;;  %v364_v58 = vmul.f32 %v350_v42, %v287_v31  ;;  %v366_v59 = vmul.f32 %v355_v43, %v287_v31 }
  0xb3   : > { %v361_v48 = vmul.f32 %v342_v44, %v288_v39  ;;  %v363_v49 = vmul.f32 %v347_v45, %v288_v39 }
  0xb5   : > { %v368_v50 = vadd.f32 %v361_v48, %v360_v46  ;;  %v375_v51 = vadd.f32 %v363_v49, %v362_v47 }
  0xb7   : > { %v369_v52 = vrot.slane %v368_v50, 4  ;;  %v376_v53 = vrot.slane %v375_v51, 4 }
  0xb9   : > { %v370_v54 = vadd.f32 %v369_v52, %v368_v50  ;;  %v377_v55 = vadd.f32 %v376_v53, %v375_v51  ;;  %v352_v56 = vpop.f32.mrf.mxu2  ;;  %v357_v57 = vpop.f32.mrf.mxu3 }
  0xba   : > { %v365_v60 = vmul.f32 %v352_v56, %v288_v39  ;;  %v367_v61 = vmul.f32 %v357_v57, %v288_v39 }
  0xbb   : > { %v371_v62 = vrot.slane %v370_v54, 2  ;;  %v378_v63 = vrot.slane %v377_v55, 2 }
  0xbc   : > { %v382_v0 = vadd.f32 %v365_v60, %v364_v58  ;;  %v389_v1 = vadd.f32 %v367_v61, %v366_v59 }
  0xbd   : > { %v372_v2 = vadd.f32 %v371_v62, %v370_v54  ;;  %v379_v3 = vadd.f32 %v378_v63, %v377_v55 }
  0xbe   : > { %v383_v4 = vrot.slane %v382_v0, 4  ;;  %v390_v5 = vrot.slane %v389_v1, 4 }
  0xbf   : > { %v373_v6 = vrot.slane %v372_v2, 1  ;;  %v380_v7 = vrot.slane %v379_v3, 1 }
  0xc0   : > { %v384_v8 = vadd.f32 %v383_v4, %v382_v0  ;;  %v391_v9 = vadd.f32 %v390_v5, %v389_v1 }
  0xc1   : > { %v374_v10 = vadd.f32 %v373_v6, %v372_v2  ;;  %v381_v11 = vadd.f32 %v380_v7, %v379_v3 }
  0xc2   : > { %v385_v12 = vrot.slane %v384_v8, 2  ;;  %v392_v13 = vrot.slane %v391_v9, 2 }
  0xc3   : > { %v401_v14 = vsel %vm400_vm15, %v381_v11, %v374_v10 }
  0xc4   : > { %v386_v15 = vadd.f32 %v385_v12, %v384_v8  ;;  %v393_v16 = vadd.f32 %v392_v13, %v391_v9 }
  0xc6   : > { %v387_v17 = vrot.slane %v386_v15, 1  ;;  %v394_v18 = vrot.slane %v393_v16, 1 }
  0xc8   : > { %v388_v19 = vadd.f32 %v387_v17, %v386_v15  ;;  %v395_v20 = vadd.f32 %v394_v18, %v393_v16 }
  0xca   : > { %v403_v21 = vsel %vm402_vm0, %v388_v19, %v401_v14 }
  0xcb   : > { %v405_v22 = vsel %vm404_vm1, %v395_v20, %v403_v21 }
  0xcc   : > { %407 = vst [vmem:[%s238_s9] sm:$0xf] %v405_v22 }
  0xcd PF: > { %s13_s16 = sadd.s32 1, %s641_s16   ;;  %s732_s12 = smov %s633_s14 }
  0xce   : > { %p10_p7 = scmp.ge.s32.totalorder %s13_s16, 6   ;;  %s733_s13 = smov %s637_s15 }
  0xcf   : > { %s734_s14 = smov %s737_s17  ;;  %s735_s15 = smov %s741_s18 }
  0xd0   :  { %12 = sbr.rel (!%p10_p7) target bundleno = 3 (0x3), region = 68 }

</bundles_post_ra>
